<compile_context>
chip_gen: v5e
topology: v5e:2x2
jax: 0.10.0
libtpu: 0.0.40
codegen_flags: <defaults>
</compile_context>

<pallas_src>
import jax
import jax.numpy as jnp
from jax.experimental import pallas as pl
from jax.experimental.pallas import tpu as pltpu

EPS = 1e-5  # InstanceNorm2d default eps

_TARGET_BLOCK_BYTES = 4 * 1024 * 1024  # ~4 MiB x block: past the HBM-roofline knee
_MAX_BLOCK_BYTES = 8 * 1024 * 1024     # hard cap: 4 pipeline buffers stay < ~36 MiB


def _round_up(a, b):
    return ((a + b - 1) // b) * b


# ----------------------------------------------------------------------------
# Path A: one fused pass — whole H*W extent per block (block last dim == hw).
# ----------------------------------------------------------------------------
def _fused_adain_kernel(x_ref, scale_ref, bias_ref, out_ref):
    x = x_ref[...].astype(jnp.float32)                     # (tr, hw), full spatial extent
    inv_n = 1.0 / x.shape[-1]
    mean = jnp.sum(x, axis=-1, keepdims=True) * inv_n
    xc = x - mean                                          # two-pass variance: no E[x^2]-E[x]^2 cancellation
    var = jnp.sum(xc * xc, axis=-1, keepdims=True) * inv_n
    a = scale_ref[...].astype(jnp.float32) * jax.lax.rsqrt(var + EPS)
    out_ref[...] = (xc * a + bias_ref[...].astype(jnp.float32)).astype(out_ref.dtype)


def _adain_fused(x2, scale, bias, rows, hw, hw_lane, target_block_bytes):
    itemsize = x2.dtype.itemsize

    # Row-tile sized to ~target_block_bytes, never above the 8-row floor needed
    # for a full-width block; keep >= 8 grid steps when rows allow so the
    # "parallel" axis load-balances both v7x TensorCores (no-op on v5e/v6e).
    tr = max(8, (target_block_bytes // (hw_lane * 4)) // 8 * 8)
    if rows >= 64:
        tr = min(tr, max(8, (rows // 8) // 8 * 8))
    if tr >= rows:
        tr = rows                                          # single (possibly <8-row) full block
    grid = (pl.cdiv(rows, tr),)

    block_bytes = _round_up(tr, 8) * hw_lane * 4
    sb_bytes = _round_up(tr, 8) * 128 * 4                  # lane-padded (tr,1) scale/bias block
    vmem_limit = max(16 << 20, 4 * block_bytes + 4 * sb_bytes + (4 << 20))

    return pl.pallas_call(
        _fused_adain_kernel,
        out_shape=jax.ShapeDtypeStruct((rows, hw), x2.dtype),
        grid=grid,
        in_specs=[
            pl.BlockSpec((tr, hw), lambda i: (i, 0)),      # last dim == full hw: no column padding visible
            pl.BlockSpec((tr, 1), lambda i: (i, 0)),       # per-tile scale
            pl.BlockSpec((tr, 1), lambda i: (i, 0)),       # per-tile bias
        ],
        out_specs=pl.BlockSpec((tr, hw), lambda i: (i, 0)),
        compiler_params=pltpu.CompilerParams(
            dimension_semantics=("parallel",),
            vmem_limit_bytes=int(vmem_limit),
        ),
        cost_estimate=pl.CostEstimate(
            flops=6 * rows * hw,
            transcendentals=rows,
            bytes_accessed=2 * rows * hw * itemsize + 4 * rows * 4,
        ),
    )(x2, scale, bias)


# ----------------------------------------------------------------------------
# Path B: very large H*W — column-tiled stats pass + fused apply pass.
# ----------------------------------------------------------------------------
def _make_stats_kernel(hw, tc):
    # TODO(synk): sum/sum-of-squares here (unlike path A's two-pass stats) can
    # lose precision for offset-heavy activations; a Welford-style merge across
    # column tiles would fix it at the cost of extra VPU work.
    need_mask = (hw % tc) != 0

    def kernel(x_ref, s1_ref, s2_ref):
        j = pl.program_id(1)

        @pl.when(j == 0)
        def _():
            s1_ref[...] = jnp.zeros_like(s1_ref)
            s2_ref[...] = jnp.zeros_like(s2_ref)

        x = x_ref[...].astype(jnp.float32)                 # (tr, tc)
        if need_mask:
            # Mask only via a (1, tc) row mask (broadcast), not a full-tile iota.
            col = jax.lax.broadcasted_iota(jnp.int32, (1, tc), 1) + j * tc
            x = jnp.where(col < hw, x, 0.0)
        s1_ref[...] += jnp.sum(x, axis=-1, keepdims=True)
        s2_ref[...] += jnp.sum(x * x, axis=-1, keepdims=True)

    return kernel


def _apply_kernel(x_ref, a_ref, b_ref, out_ref):
    out_ref[...] = (
        x_ref[...].astype(jnp.float32) * a_ref[...] + b_ref[...]
    ).astype(out_ref.dtype)


def _adain_col_tiled(x2, scale, bias, rows, hw, hw_lane, target_block_bytes):
    itemsize = x2.dtype.itemsize

    tr = rows if rows < 8 else 8
    tc = max(128, min(hw_lane, (target_block_bytes // (max(tr, 8) * 4)) // 128 * 128))
    if tc >= hw:
        tc = hw                                            # full-dim block if budget covers all columns
    grid = (pl.cdiv(rows, tr), pl.cdiv(hw, tc))

    block_bytes = _round_up(tr, 8) * _round_up(tc, 128) * 4
    sb_bytes = _round_up(tr, 8) * 128 * 4
    vmem_limit = int(max(16 << 20, 4 * block_bytes + 8 * sb_bytes + (4 << 20)))

    # Pass 1: per-row sum / sum-of-squares, accumulated in the resident (tr,1) outputs.
    s1, s2 = pl.pallas_call(
        _make_stats_kernel(hw, tc),
        out_shape=(
            jax.ShapeDtypeStruct((rows, 1), jnp.float32),
            jax.ShapeDtypeStruct((rows, 1), jnp.float32),
        ),
        grid=grid,
        in_specs=[pl.BlockSpec((tr, tc), lambda i, j: (i, j))],
        out_specs=(
            pl.BlockSpec((tr, 1), lambda i, j: (i, 0)),
            pl.BlockSpec((tr, 1), lambda i, j: (i, 0)),
        ),
        compiler_params=pltpu.CompilerParams(
            dimension_semantics=("parallel", "arbitrary"),
            vmem_limit_bytes=vmem_limit,
        ),
        cost_estimate=pl.CostEstimate(
            flops=3 * rows * hw,
            transcendentals=0,
            bytes_accessed=rows * hw * itemsize + 8 * rows,
        ),
    )(x2)

    # Tiny per-row reduction of the stats into effective scale/shift (plain JAX).
    inv_n = 1.0 / float(hw)
    mean = s1 * inv_n
    var = jnp.maximum(s2 * inv_n - mean * mean, 0.0)
    a = scale.astype(jnp.float32) * jax.lax.rsqrt(var + EPS)
    b = bias.astype(jnp.float32) - mean * a

    # Pass 2: fused normalize + modulate, lane-dense (tr, tc) blocks.
    return pl.pallas_call(
        _apply_kernel,
        out_shape=jax.ShapeDtypeStruct((rows, hw), x2.dtype),
        grid=grid,
        in_specs=[
            pl.BlockSpec((tr, tc), lambda i, j: (i, j)),
            pl.BlockSpec((tr, 1), lambda i, j: (i, 0)),
            pl.BlockSpec((tr, 1), lambda i, j: (i, 0)),
        ],
        out_specs=pl.BlockSpec((tr, tc), lambda i, j: (i, j)),
        compiler_params=pltpu.CompilerParams(
            dimension_semantics=("parallel", "parallel"),
            vmem_limit_bytes=vmem_limit,
        ),
        cost_estimate=pl.CostEstimate(
            flops=2 * rows * hw,
            transcendentals=0,
            bytes_accessed=2 * rows * hw * itemsize + 8 * rows,
        ),
    )(x2, a, b)


# ----------------------------------------------------------------------------
# Public forward + reference
# ----------------------------------------------------------------------------
def adain_forward(x, style, weight, affine_bias, *, max_block_bytes=None):
    """x: (B, C, H, W), style: (B, style_dim),
    weight: (2C, style_dim) (pre spectral-norm), affine_bias: (2C,)."""
    B, C, H, W = x.shape
    rows, hw = B * C, H * W

    # Spectral norm of the Linear weight (plain-JAX glue).
    # TODO(synk): PyTorch's spectral_norm uses 1-step power iteration with a
    # persistent random u buffer; we use the exact spectral norm (SVD).
    sigma = jnp.linalg.svd(weight, compute_uv=False)[0]
    w_sn = weight / sigma

    # Tiny affine projection left to XLA.
    style2 = style @ w_sn.T + affine_bias                   # (B, 2C)
    scale = style2[:, :C].reshape(rows, 1)
    bias = style2[:, C:].reshape(rows, 1)

    x2 = x.reshape(rows, hw)                                # metadata-only reshape, no HBM pass

    target = _TARGET_BLOCK_BYTES if max_block_bytes is None else int(max_block_bytes)
    hard = _MAX_BLOCK_BYTES if max_block_bytes is None else int(max_block_bytes)
    hw_lane = _round_up(hw, 128)

    if 8 * hw_lane * 4 <= hard:
        out2 = _adain_fused(x2, scale, bias, rows, hw, hw_lane, target)
    else:
        out2 = _adain_col_tiled(x2, scale, bias, rows, hw, hw_lane, target)
    return out2.reshape(B, C, H, W)


def adain_reference(x, style, weight, affine_bias):
    """Pure-JAX reference mirroring the PyTorch forward."""
    B, C, H, W = x.shape
    sigma = jnp.linalg.svd(weight, compute_uv=False)[0]
    w_sn = weight / sigma
    style2 = style @ w_sn.T + affine_bias                   # (B, 2C)
    style4 = style2.reshape(B, -1, 1, 1)
    scale, bias = style4[:, :C], style4[:, C:]
    mean = jnp.mean(x, axis=(2, 3), keepdims=True)
    var = jnp.mean((x - mean) ** 2, axis=(2, 3), keepdims=True)
    norm = (x - mean) * jax.lax.rsqrt(var + EPS)
    return scale * norm + bias


def _run_case(key, B, C, H, W, style_dim, **fwd_kwargs):
    kx, ks, kw = jax.random.split(key, 3)
    x = jax.random.normal(kx, (B, C, H, W), dtype=jnp.float32)
    style = jax.random.normal(ks, (B, style_dim), dtype=jnp.float32)
    bound = 1.0 / (style_dim ** 0.5)
    weight = jax.random.uniform(
        kw, (2 * C, style_dim), minval=-bound, maxval=bound, dtype=jnp.float32
    )
    affine_bias = jnp.concatenate(
        [jnp.ones((C,), jnp.float32), jnp.zeros((C,), jnp.float32)]
    )
    out = jax.block_until_ready(adain_forward(x, style, weight, affine_bias, **fwd_kwargs))
    ref = adain_reference(x, style, weight, affine_bias)
    assert out.shape == (B, C, H, W)
    assert jnp.allclose(out, ref, atol=1e-4, rtol=1e-4)


if __name__ == "__main__":
    key = jax.random.PRNGKey(0)
    k1, k2, k3 = jax.random.split(key, 3)

    # Main case: aligned shapes (B=2, C=4, H=W=16, style_dim=32) -> fused path.
    _run_case(k1, B=2, C=4, H=16, W=16, style_dim=32)

    # Unaligned case: rows=6 (<8, not a multiple of 8), H*W=100 (not a multiple
    # of 128) -> fused path with full-dim blocks, no wrapper pad/slice.
    _run_case(k2, B=2, C=3, H=10, W=10, style_dim=32)

    # Column-tiled path, forced via a tiny block budget so it runs at small
    # shapes: rows=10 (partial last row tile), H*W=2500 (partial last column
    # tile -> in-kernel (1, tc) column mask).
    _run_case(k3, B=2, C=5, H=50, W=50, style_dim=32, max_block_bytes=64 * 1024)

    print("KERNEL_OK")
</pallas_src>

<mosaic_0001>
module attributes {stable_mosaic.version = 11 : i64} {
  func.func @_fused_adain_kernel(%arg0: i32, %arg1: memref<8x256xf32, #tpu.memory_space<vmem>>, %arg2: memref<8x1xf32, #tpu.memory_space<vmem>>, %arg3: memref<8x1xf32, #tpu.memory_space<vmem>>, %arg4: memref<8x256xf32, #tpu.memory_space<vmem>>) attributes {dimension_semantics = [#tpu.dimension_semantics<parallel>], iteration_bounds = array<i64: 1>, scalar_prefetch = 0 : i64, scratch_operands = 0 : i64, tpu.core_type = #tpu.core_type<tc>, window_params = [{transform_indices = @transform_0, window_bounds = array<i64: 8, 256>}, {transform_indices = @transform_1, window_bounds = array<i64: 8, 1>}, {transform_indices = @transform_2, window_bounds = array<i64: 8, 1>}, {transform_indices = @transform_3, window_bounds = array<i64: 8, 256>}]} {
    %c0 = arith.constant 0 : index
    %c0_0 = arith.constant 0 : index
    %0 = vector.load %arg1[%c0, %c0_0] : memref<8x256xf32, #tpu.memory_space<vmem>>, vector<8x256xf32>
    %cst = arith.constant dense<0.000000e+00> : vector<8xf32>
    %1 = vector.multi_reduction <add>, %0, %cst [1] : vector<8x256xf32> to vector<8xf32>
    %2 = vector.shape_cast %1 : vector<8xf32> to vector<8x1xf32>
    %cst_1 = arith.constant 3.906250e-03 : f32
    %3 = vector.broadcast %cst_1 : f32 to vector<8x1xf32>
    %4 = arith.mulf %2, %3 : vector<8x1xf32>
    %5 = vector.broadcast %4 : vector<8x1xf32> to vector<8x256xf32>
    %6 = arith.subf %0, %5 : vector<8x256xf32>
    %7 = arith.mulf %6, %6 : vector<8x256xf32>
    %cst_2 = arith.constant dense<0.000000e+00> : vector<8xf32>
    %8 = vector.multi_reduction <add>, %7, %cst_2 [1] : vector<8x256xf32> to vector<8xf32>
    %9 = vector.shape_cast %8 : vector<8xf32> to vector<8x1xf32>
    %cst_3 = arith.constant 3.906250e-03 : f32
    %10 = vector.broadcast %cst_3 : f32 to vector<8x1xf32>
    %11 = arith.mulf %9, %10 : vector<8x1xf32>
    %c0_4 = arith.constant 0 : index
    %c0_5 = arith.constant 0 : index
    %12 = vector.load %arg2[%c0_4, %c0_5] : memref<8x1xf32, #tpu.memory_space<vmem>>, vector<8x1xf32>
    %cst_6 = arith.constant 9.99999974E-6 : f32
    %13 = vector.broadcast %cst_6 : f32 to vector<8x1xf32>
    %14 = arith.addf %11, %13 : vector<8x1xf32>
    %15 = math.rsqrt %14 : vector<8x1xf32>
    %16 = arith.mulf %12, %15 : vector<8x1xf32>
    %17 = vector.broadcast %16 : vector<8x1xf32> to vector<8x256xf32>
    %18 = arith.mulf %6, %17 : vector<8x256xf32>
    %c0_7 = arith.constant 0 : index
    %c0_8 = arith.constant 0 : index
    %19 = vector.load %arg3[%c0_7, %c0_8] : memref<8x1xf32, #tpu.memory_space<vmem>>, vector<8x1xf32>
    %20 = vector.broadcast %19 : vector<8x1xf32> to vector<8x256xf32>
    %21 = arith.addf %18, %20 : vector<8x256xf32>
    %c0_9 = arith.constant 0 : index
    %c0_10 = arith.constant 0 : index
    %22 = vector.load %arg4[%c0_9, %c0_10] : memref<8x256xf32, #tpu.memory_space<vmem>>, vector<8x256xf32>
    tpu.vector_store %arg4[%c0_9, %c0_10], %21 {strides = array<i32>} : memref<8x256xf32, #tpu.memory_space<vmem>>, vector<8x256xf32>,
    return
  }
  func.func @transform_0(%arg0: i32) -> (i32, i32) {
    %c0_i32 = arith.constant 0 : i32
    %c0_i32_0 = arith.constant 0 : i32
    return %arg0, %c0_i32 : i32, i32
  }
  func.func @transform_1(%arg0: i32) -> (i32, i32) {
    %c0_i32 = arith.constant 0 : i32
    %c0_i32_0 = arith.constant 0 : i32
    return %arg0, %c0_i32 : i32, i32
  }
  func.func @transform_2(%arg0: i32) -> (i32, i32) {
    %c0_i32 = arith.constant 0 : i32
    %c0_i32_0 = arith.constant 0 : i32
    return %arg0, %c0_i32 : i32, i32
  }
  func.func @transform_3(%arg0: i32) -> (i32, i32) {
    %c0_i32 = arith.constant 0 : i32
    %c0_i32_0 = arith.constant 0 : i32
    return %arg0, %c0_i32 : i32, i32
  }
}

</mosaic_0001>

<bundles_post_ra>
// kernel: tpu_custom_call.1
= control target key start
LH: loop header
LB: loop body
LE: loop exit
PB: predicated region body
PF: predicated region fallthrough
CT: control target
= control target key end

     0   :  { %s144_s0 = inlined_call_operand.vmem [shape: f32[8,256], index: 0, kind: input, shape index: {}]   ;;  %s145_s1 = inlined_call_operand.vmem [shape: f32[8,1], index: 1, kind: input, shape index: {}]   ;;  %s146_s2 = inlined_call_operand.vmem [shape: f32[8,1], index: 2, kind: input, shape index: {}]   ;;  %s147_s3 = inlined_call_operand.hbm [shape: f32[8,256], index: 3, kind: output, shape index: {}]  }
   0x1   :  { %v15_v0 = vld [vmem:[%s144_s0] sm:$0xff]  ;;  %v16_v1 = vld [vmem:[%s144_s0 + $0x8] sm:$0xff] }
   0x2   :  { %8 = vsyncpa [#allocation3], 0  ;;  %v17_v2 = vadd.f32 %v16_v1, %v15_v0  ;;  %v107_v10 = vmov 0   ;;  %v29_v19 = vld [vmem:[%s145_s1] sm:$0xff]  ;;  %s108_s19 = smov [#allocation2]   ;;  %s66_s23 = sshll.u32 %s147_s3, 4  ;;  %s67_s23 = int_to_ptr.hbm [resolvable:$true] %s66_s23 }
   0x3   :  { %77 = vset.pattern.permute.xlu1 %v107_v10  ;;  %78 = vset.pattern.permute.xlu0 %v107_v10  ;;  %v49_v23 = vld [vmem:[%s146_s2] sm:$0xff]  ;;  %s64_s20 = sshll.u32 %s108_s19, 4  ;;  %s65_s20 = int_to_ptr.vmem [resolvable:$true] %s64_s20 }
   0x4   :  { %18 = vadd.xlane.f32.xlu0 %v17_v2 }
  0x77   :  { %v19_v3 = vpop.xlane.xlu0 %18 }
  0x78   :  { %v20_v4 = vmul.f32 0.00390625, %v19_v3 }
  0x7a   :  { %v21_v5 = vsub.f32 %v15_v0, %v20_v4  ;;  %v22_v6 = vsub.f32 %v16_v1, %v20_v4 }
  0x7c   :  { %v23_v7 = vmul.f32 %v21_v5, %v21_v5  ;;  %v24_v8 = vmul.f32 %v22_v6, %v22_v6 }
  0x7e   :  { %v25_v9 = vadd.f32 %v24_v8, %v23_v7 }
  0x80   :  { %26 = vadd.xlane.f32.xlu0 %v25_v9 }
  0xf3   :  { %v27_v11 = vpop.xlane.xlu0 %26 }
  0xf4   :  { %v28_v12 = vmul.f32 0.00390625, %v27_v11 }
  0xf6   :  { %v30_v13 = vadd.f32 1e-05, %v28_v12 }
  0xf8   :  { %79 = vrsqrt.f32 %v30_v13  ;;  %vm37_vm1 = vweird.f32 %v30_v13 }
  0xfe   :  { %v80_v14 = vpop.eup %79 }
  0xff   :  { %v32_v15 = vmul.f32 %v80_v14, %v30_v13  ;;  %vm38_vm0 = vweird.f32 %v80_v14 }
 0x100   :  { %vm39_vm2 = vmor %vm37_vm1, %vm38_vm0 }
 0x101   :  { %v33_v16 = vmul.f32 %v80_v14, %v32_v15 }
 0x103   :  { %v34_v17 = vmul.f32 0.5, %v33_v16 }
 0x105   :  { %v35_v18 = vsub.f32 1.5, %v34_v17 }
 0x107   :  { %v36_v20 = vmul.f32 %v80_v14, %v35_v18 }
 0x109   :  { %v40_v21 = vsel %vm39_vm2, %v80_v14, %v36_v20 }
 0x10a   :  { %v41_v22 = vmul.f32 %v40_v21, %v29_v19 }
 0x10c   :  { %44 = vperm.xlu1 %77, %v41_v22  }
 0x114   :  { %52 = vperm.xlu1 %77, %v49_v23  }
 0x17e   :  { %v45_v24 = vpop.permute.xlu1 %44 }
 0x17f   :  { %v47_v25 = vmul.f32 %v45_v24, %v21_v5  ;;  %v48_v26 = vmul.f32 %v45_v24, %v22_v6 }
 0x186   :  { %v53_v27 = vpop.permute.xlu1 %52 }
 0x187   :  { %v55_v28 = vadd.f32 %v53_v27, %v47_v25  ;;  %v56_v29 = vadd.f32 %v53_v27, %v48_v26 }
 0x189   :  { %57 = vst [vmem:[#allocation2] sm:$0xff] %v55_v28 }
 0x18a   :  { %58 = vst [vmem:[#allocation2 + $0x8] sm:$0xff] %v56_v29 }
 0x18b   :  { %69 = dma.vmem_to_hbm [thread:$0]  %s65_s20, 256, %s67_s23, [#allocation3]  }
 0x18c   :  { %105 = dma.done.wait [#allocation3], 256  }
 0x18d   :  { %106 = vsyncadd [#allocation3], 4294967040 }
 0x18e   :  { %74 = vsyncpa [#allocation3], 1 }

</bundles_post_ra>
